<compile_context>
chip_gen: v7x
topology: tpu7x:2x2x1
jax: 0.10.0
libtpu: 0.0.40
codegen_flags: <defaults>
</compile_context>

<pallas_src>
import jax
import jax.numpy as jnp
from jax.experimental import pallas as pl
from jax.experimental.pallas import tpu as pltpu

LANE = 128
MAX_TILE_B = 512   # sweepable 256-1024; mem-bound kernels hit ~85% of HBM roofline at 512


def duq_kernel(x_ref, w_ref, emb_ref, avg_ref, o_ref):
    # x arrives in its HBM dtype (f32); cast to bf16 in-kernel so the activation
    # stream is a single 4 B/elem read (no separate wrapper astype pass over HBM).
    x_bf = x_ref[...].astype(jnp.bfloat16)
    # Fused feature-extraction + RBF-weight matmul: (tb, F) @ (F, C*D),
    # bf16 operands with f32 accumulation on the MXU.
    zw = jnp.dot(x_bf, w_ref[...], preferred_element_type=jnp.float32)      # (tb, C*D) f32
    diff = zw - emb_ref[...]                                                # f32, VPU
    sq = diff * diff
    # mean over m and the -1/(2*sigma^2) scale are folded into avg_ref (bf16, entries
    # exactly representable); padded lanes are zero -> exp(0)=1 there, sliced off later.
    o_ref[...] = jnp.exp(
        jnp.dot(sq.astype(jnp.bfloat16), avg_ref[...],
                preferred_element_type=jnp.float32))                        # (tb, 128) f32


def _round_up(x, m):
    return ((x + m - 1) // m) * m


def _pick_tile_b(b, max_tile=MAX_TILE_B):
    """Choose the batch tile: as big as possible, but give medium batches >= 2 grid
    steps so both v7x TensorCores get work along the 'parallel' axis."""
    if b <= 32:
        return max(8, _round_up(b, 8))                 # tiny batch: single small step
    if b <= max_tile:
        return max(16, _round_up((b + 1) // 2, 16))    # split into ~2 steps
    return max_tile


def duq_forward(x, w_fused, emb_flat, avg_scaled, num_classes):
    """Runs the DUQ forward pass. Returns (B, num_classes) float32."""
    b = x.shape[0]
    x_flat = x.reshape(b, -1)                 # no pad, no cast: single HBM read of x
    f = x_flat.shape[1]
    cd = w_fused.shape[1]
    n_pad = avg_scaled.shape[1]               # lane-dense output width (128)

    tile_b = _pick_tile_b(b)
    grid = pl.cdiv(b, tile_b)                 # partial last block handled by Pallas masking

    # Explicit VMEM budget: double-buffered x/out tiles + resident weights + headroom.
    # TODO(synk): for very large F (>~8K, real feature extractors) add an "arbitrary"
    #   K grid axis over F with a (tile_b, C*D) f32 VMEM accumulator instead of
    #   shrinking tile_b (v7x has only 64 MiB VMEM).
    vmem_bytes = 2 * (
        tile_b * f * x_flat.dtype.itemsize    # x tile (native dtype)
        + f * cd * 2                          # w_fused (bf16, resident)
        + cd * 4                              # emb_flat (f32, resident)
        + cd * n_pad * 2                      # avg_scaled (bf16, resident)
        + tile_b * n_pad * 4                  # output tile (f32)
    ) + (2 << 20)
    vmem_limit = int(min(max(vmem_bytes, 16 << 20), 64 << 20))

    out = pl.pallas_call(
        duq_kernel,
        out_shape=jax.ShapeDtypeStruct((b, n_pad), jnp.float32),
        grid_spec=pltpu.PrefetchScalarGridSpec(
            num_scalar_prefetch=0,
            grid=(grid,),
            in_specs=[
                pl.BlockSpec((tile_b, f), lambda i: (i, 0)),   # batch tile (f32 in HBM)
                pl.BlockSpec((f, cd), lambda i: (0, 0)),       # fused weight (resident)
                pl.BlockSpec((1, cd), lambda i: (0, 0)),       # embeddings (resident)
                pl.BlockSpec((cd, n_pad), lambda i: (0, 0)),   # scaled avg matrix (resident)
            ],
            out_specs=pl.BlockSpec((tile_b, n_pad), lambda i: (i, 0)),
        ),
        compiler_params=pltpu.CompilerParams(
            dimension_semantics=("parallel",),
            vmem_limit_bytes=vmem_limit,
        ),
    )(x_flat, w_fused, emb_flat, avg_scaled)

    return out[:, :num_classes]


def prepare_duq_params(w_feat, W, m_buf, N_buf, sigma):
    """Plain-JAX parameter prep (done ONCE per model, not per forward).

    Returns tensors already in their kernel dtypes so the per-call wrapper does
    no HBM re-casting passes.
    """
    D, C, _ = W.shape
    # w2[j, c*D + m] = W[m, c, j]
    w2 = jnp.transpose(W, (2, 1, 0)).reshape(D, C * D)
    # Fuse feature extractor and RBF weights: one full-depth K=F matmul in-kernel.
    # TODO(synk): for tiny-batch inference on v5e the fused weight (C x larger than
    #   w_feat + W) dominates HBM traffic; a two-matmul kernel variant would win there.
    w_fused = jnp.dot(w_feat, w2, precision=jax.lax.Precision.HIGHEST)       # (F, C*D)
    # emb_flat[0, c*D + m] = (m / N)[m, c]
    emb = m_buf / N_buf[None, :]                                             # (D, C)
    emb_flat = emb.T.reshape(1, C * D).astype(jnp.float32)
    # Block-diagonal averaging matrix with the -1/(2*sigma^2) scale folded in,
    # zero-padded to a lane-dense 128-wide output.
    n_pad = max(LANE, pl.cdiv(C, LANE) * LANE)
    scale = -1.0 / (2.0 * D * sigma * sigma)
    avg = jnp.repeat(jnp.eye(C, dtype=jnp.float32), D, axis=0) * scale       # (C*D, C)
    avg_scaled = jnp.pad(avg, ((0, 0), (0, n_pad - C)))                      # (C*D, n_pad)
    return (w_fused.astype(jnp.bfloat16),
            emb_flat,
            avg_scaled.astype(jnp.bfloat16))


def ref_forward(x, w_feat, W, m_buf, N_buf, sigma):
    """Pure-JAX reference mirroring DUQModel.forward / DUQModel.rbf."""
    b = x.shape[0]
    z = jnp.dot(x.reshape(b, -1), w_feat,
                precision=jax.lax.Precision.HIGHEST)                   # (B, D)
    zw = jnp.einsum('ij,mnj->imn', z, W,
                    precision=jax.lax.Precision.HIGHEST)               # (B, D, C)
    emb = m_buf / N_buf[None, :]                                       # (D, C)
    diff = zw - emb[None, :, :]
    return jnp.exp(-jnp.mean(diff ** 2, axis=1) / (2.0 * sigma ** 2))  # (B, C)


if __name__ == "__main__":
    key = jax.random.PRNGKey(0)
    k_x, k_wf, k_W, k_m = jax.random.split(key, 4)

    # Small shapes consistent with the module's forward.
    B, C_in, H, Wsp = 2, 4, 16, 16       # NCHW input
    D = 32                               # model_output_size
    C = 8                                # num_classes
    F = C_in * H * Wsp
    sigma = 0.5                          # length_scale
    gamma = 0.999                        # unused in forward (only in update_embeddings)

    x = jax.random.normal(k_x, (B, C_in, H, Wsp), dtype=jnp.float32)

    # Synthetic feature extractor: flatten + linear (no bias), deterministic init.
    w_feat = jax.random.normal(k_wf, (F, D), dtype=jnp.float32) / jnp.sqrt(F)

    # W: (D, C, D), kaiming_normal_ (relu) -> std = sqrt(2 / fan_in), fan_in = C*D
    W = jax.random.normal(k_W, (D, C, D), dtype=jnp.float32) * jnp.sqrt(2.0 / (C * D))

    # Buffers: N = 13, m = normal(0, 0.05) * N  (as in __init__)
    N_buf = jnp.zeros((C,), jnp.float32) + 13.0
    m_buf = jax.random.normal(k_m, (D, C), dtype=jnp.float32) * 0.05
    m_buf = m_buf * N_buf[None, :]

    # Kernel-side fused / padded parameters (plain-JAX glue, done once per model).
    w_fused, emb_flat, avg_scaled = prepare_duq_params(w_feat, W, m_buf, N_buf, sigma)

    y_pred = duq_forward(x, w_fused, emb_flat, avg_scaled, C)
    y_pred = jax.block_until_ready(y_pred)

    y_ref = ref_forward(x, w_feat, W, m_buf, N_buf, sigma)
    assert y_pred.shape == (B, C)
    # bf16 MXU inputs on both matmuls (f32 accumulation): relaxed vs f32 HIGHEST ref.
    assert jnp.allclose(y_pred, y_ref, rtol=2e-2, atol=2e-2), (y_pred, y_ref)

    print("KERNEL_OK")
</pallas_src>

<mosaic_0001>
module attributes {stable_mosaic.version = 11 : i64} {
  func.func @duq_kernel(%arg0: i32, %arg1: memref<8x1024xf32, #tpu.memory_space<vmem>>, %arg2: memref<1024x256xbf16, #tpu.memory_space<vmem>>, %arg3: memref<1x256xf32, #tpu.memory_space<vmem>>, %arg4: memref<256x128xbf16, #tpu.memory_space<vmem>>, %arg5: memref<8x128xf32, #tpu.memory_space<vmem>>) attributes {dimension_semantics = [#tpu.dimension_semantics<parallel>], iteration_bounds = array<i64: 1>, scalar_prefetch = 0 : i64, scratch_operands = 0 : i64, tpu.core_type = #tpu.core_type<tc>, window_params = [{transform_indices = @transform_0, window_bounds = array<i64: 8, 1024>}, {pipeline_mode = #tpu.pipeline_mode<synchronous>, transform_indices = @transform_1, window_bounds = array<i64: 1024, 256>}, {pipeline_mode = #tpu.pipeline_mode<synchronous>, transform_indices = @transform_2, window_bounds = array<i64: 1, 256>}, {pipeline_mode = #tpu.pipeline_mode<synchronous>, transform_indices = @transform_3, window_bounds = array<i64: 256, 128>}, {transform_indices = @transform_4, window_bounds = array<i64: 8, 128>}]} {
    %c0 = arith.constant 0 : index
    %c0_0 = arith.constant 0 : index
    %0 = vector.load %arg1[%c0, %c0_0] : memref<8x1024xf32, #tpu.memory_space<vmem>>, vector<8x1024xf32>
    %1 = arith.truncf %0 : vector<8x1024xf32> to vector<8x1024xbf16>
    %c0_1 = arith.constant 0 : index
    %c0_2 = arith.constant 0 : index
    %2 = vector.load %arg2[%c0_1, %c0_2] : memref<1024x256xbf16, #tpu.memory_space<vmem>>, vector<1024x256xbf16>
    %cst = arith.constant dense<0.000000e+00> : vector<8x256xf32>
    %3 = tpu.matmul %1, %2, %cst {dimension_numbers = #tpu.dot_dimension_numbers<[1], [0], [0], [1], [0, 0, 1, 1], [], []>} : vector<8x1024xbf16>, vector<1024x256xbf16>, vector<8x256xf32> -> vector<8x256xf32>
    %c0_3 = arith.constant 0 : index
    %c0_4 = arith.constant 0 : index
    %4 = vector.load %arg3[%c0_3, %c0_4] : memref<1x256xf32, #tpu.memory_space<vmem>>, vector<1x256xf32>
    %5 = vector.broadcast %4 : vector<1x256xf32> to vector<8x256xf32>
    %6 = arith.subf %3, %5 : vector<8x256xf32>
    %7 = arith.mulf %6, %6 : vector<8x256xf32>
    %8 = arith.truncf %7 : vector<8x256xf32> to vector<8x256xbf16>
    %c0_5 = arith.constant 0 : index
    %c0_6 = arith.constant 0 : index
    %9 = vector.load %arg4[%c0_5, %c0_6] : memref<256x128xbf16, #tpu.memory_space<vmem>>, vector<256x128xbf16>
    %cst_7 = arith.constant dense<0.000000e+00> : vector<8x128xf32>
    %10 = tpu.matmul %8, %9, %cst_7 {dimension_numbers = #tpu.dot_dimension_numbers<[1], [0], [0], [1], [0, 0, 1, 1], [], []>} : vector<8x256xbf16>, vector<256x128xbf16>, vector<8x128xf32> -> vector<8x128xf32>
    %11 = math.exp %10 : vector<8x128xf32>
    %c0_8 = arith.constant 0 : index
    %c0_9 = arith.constant 0 : index
    %12 = vector.load %arg5[%c0_8, %c0_9] : memref<8x128xf32, #tpu.memory_space<vmem>>, vector<8x128xf32>
    tpu.vector_store %arg5[%c0_8, %c0_9], %11 {strides = array<i32>} : memref<8x128xf32, #tpu.memory_space<vmem>>, vector<8x128xf32>,
    return
  }
  func.func @transform_0(%arg0: i32) -> (i32, i32) {
    %c0_i32 = arith.constant 0 : i32
    %c0_i32_0 = arith.constant 0 : i32
    return %arg0, %c0_i32 : i32, i32
  }
  func.func @transform_1(%arg0: i32) -> (i32, i32) {
    %c0_i32 = arith.constant 0 : i32
    %c0_i32_0 = arith.constant 0 : i32
    %c0_i32_1 = arith.constant 0 : i32
    return %c0_i32, %c0_i32_0 : i32, i32
  }
  func.func @transform_2(%arg0: i32) -> (i32, i32) {
    %c0_i32 = arith.constant 0 : i32
    %c0_i32_0 = arith.constant 0 : i32
    %c0_i32_1 = arith.constant 0 : i32
    return %c0_i32, %c0_i32_0 : i32, i32
  }
  func.func @transform_3(%arg0: i32) -> (i32, i32) {
    %c0_i32 = arith.constant 0 : i32
    %c0_i32_0 = arith.constant 0 : i32
    %c0_i32_1 = arith.constant 0 : i32
    return %c0_i32, %c0_i32_0 : i32, i32
  }
  func.func @transform_4(%arg0: i32) -> (i32, i32) {
    %c0_i32 = arith.constant 0 : i32
    %c0_i32_0 = arith.constant 0 : i32
    return %arg0, %c0_i32 : i32, i32
  }
}

</mosaic_0001>

<bundles_post_ra>
// kernel: tpu_custom_call.1
= control target key start
LH: loop header
LB: loop body
LE: loop exit
PB: predicated region body
PF: predicated region fallthrough
CT: control target
= control target key end

     0   :  { %9 = vsyncpa [#allocation3], 0  ;;  %s1918_s0 = inlined_call_operand.hbm [shape: f32[2,1024], index: 0, kind: input, shape index: {}]   ;;  %s1919_s1 = inlined_call_operand.hbm [shape: bf16[1024,256], index: 1, kind: input, shape index: {}]   ;;  %s1920_s2 = inlined_call_operand.vmem [shape: f32[1,256], index: 2, kind: input, shape index: {}]   ;;  %s1921_s3 = inlined_call_operand.hbm [shape: bf16[256,128], index: 3, kind: input, shape index: {}]   ;;  %s1922_s4 = inlined_call_operand.hbm [shape: f32[2,128], index: 4, kind: output, shape index: {}]  }
   0x1   :  { %10 = vsyncpa [#allocation6], 0 }
   0x2   :  { %11 = vsyncpa [#allocation4], 0 }
   0x3   :  { %16 = vsyncadd [#allocation3], 768  ;;  %s1808_s15 = smov [#allocation5]   ;;  %s1714_s19 = scalar_lea.hbm %s1919_s1, 16384 }
   0x4   :  { %s29_s16 = sshll.u32 %s1808_s15, 4  ;;  %p1715_p0 = scmp.ne.s32.totalorder %s1919_s1, %s1714_s19  ;;  %s30_s16 = int_to_ptr.vmem [resolvable:$true] %s29_s16 }
   0x5   :  { %p1718_p1 = scmp.lt.u32.totalorder %s1714_s19, %s1919_s1 }
   0x7   :  { %p1720_p2 = pnand %p1718_p1, %p1715_p0 }
   0x9   :  { %1723 = shalt.err (!%p1720_p2)
}
   0xa   :  { %s1724_s24 = scalar_lea.vmem %s30_s16, 16384  ;;  %p1729_p4 = scmp.lt.s32.totalorder %s30_s16, %s30_s16 }
   0xb   :  { %p1725_p3 = scmp.ne.s32.totalorder %s30_s16, %s1724_s24  ;;  %p1730_p5 = scmp.lt.s32.totalorder %s1724_s24, %s1724_s24 }
   0xd   :  { %p1731_p6 = por %p1730_p5, %p1729_p4 }
   0xf   :  { %p1732_p7 = pnand %p1731_p6, %p1725_p3 }
  0x11   :  { %1735 = shalt.err (!%p1732_p7)
}
  0x12   :  { %s1809_s25 = smov 128   ;;  %s1810_s26 = smov 8  }
  0x13   :  { %35 = dma.hbm_to_vmem [thread:$0]  %s1919_s1, 16384, %s30_s16, [#allocation6], %s1809_s25, %s1809_s25, %s1810_s26  }
  0x14   :  { %s1811_s29 = smov [#allocation2]   ;;  %s1736_s7 = scalar_lea.hbm %s1918_s0, 256 }
  0x15   :  { %s17_s30 = sshll.u32 %s1811_s29, 4  ;;  %p1737_p8 = scmp.ne.s32.totalorder %s1918_s0, %s1736_s7  ;;  %s18_s30 = int_to_ptr.vmem [resolvable:$true] %s17_s30 }
  0x16   :  { %p1740_p9 = scmp.lt.u32.totalorder %s1736_s7, %s1918_s0 }
  0x18   :  { %p1742_p10 = pnand %p1740_p9, %p1737_p8 }
  0x1a   :  { %1745 = shalt.err (!%p1742_p10)
}
  0x1b   :  { %s1746_s12 = scalar_lea.vmem %s18_s30, 256  ;;  %s1750_s1 = scalar_lea.vmem %s18_s30, 1024 }
  0x1c   :  { %p1747_p11 = scmp.ne.s32.totalorder %s18_s30, %s1746_s12  ;;  %p1751_p12 = scmp.lt.s32.totalorder %s18_s30, %s18_s30 }
  0x1d   :  { %p1752_p13 = scmp.lt.s32.totalorder %s1750_s1, %s1746_s12 }
  0x1f   :  { %p1753_p0 = por %p1752_p13, %p1751_p12 }
  0x21   :  { %p1754_p1 = pnand %p1753_p0, %p1747_p11 }
  0x23   :  { %1757 = shalt.err (!%p1754_p1)
}
  0x24   :  { %s1812_s13 = smov 256   ;;  %s1813_s14 = smov 16  }
  0x25   :  { %23 = dma.hbm_to_vmem [thread:$0]  %s1918_s0, 256, %s18_s30, [#allocation3], %s1812_s13, %s1812_s13, %s1813_s14  }
  0x26   :  { %s1814_s17 = smov [#allocation7]   ;;  %s1758_s21 = scalar_lea.hbm %s1921_s3, 2048 }
  0x27   :  { %s43_s18 = sshll.u32 %s1814_s17, 4  ;;  %p1759_p2 = scmp.ne.s32.totalorder %s1921_s3, %s1758_s21  ;;  %s44_s18 = int_to_ptr.vmem [resolvable:$true] %s43_s18 }
  0x28   :  { %p1762_p3 = scmp.lt.u32.totalorder %s1758_s21, %s1921_s3 }
  0x2a   :  { %p1764_p4 = pnand %p1762_p3, %p1759_p2 }
  0x2c   :  { %1767 = shalt.err (!%p1764_p4)
}
  0x2d   :  { %s1768_s26 = scalar_lea.vmem %s44_s18, 2048  ;;  %p1773_p6 = scmp.lt.s32.totalorder %s44_s18, %s44_s18 }
  0x2e   :  { %p1769_p5 = scmp.ne.s32.totalorder %s44_s18, %s1768_s26  ;;  %p1774_p7 = scmp.lt.s32.totalorder %s1768_s26, %s1768_s26 }
  0x30   :  { %p1775_p8 = por %p1774_p7, %p1773_p6 }
  0x32   :  { %p1776_p9 = pnand %p1775_p8, %p1769_p5 }
  0x34   :  { %1779 = shalt.err (!%p1776_p9)
}
  0x35   :  { %s1815_s0 = smov 64   ;;  %s1816_s27 = smov 4  }
  0x36   :  { %49 = dma.hbm_to_vmem [thread:$0]  %s1921_s3, 2048, %s44_s18, [#allocation6], %s1815_s0, %s1815_s0, %s1816_s27  }
  0x37   :  { %1802 = dma.done.wait [#allocation3], 1024  }
  0x38   :  { %1803 = vsyncadd [#allocation3], 4294966272 }
  0x39   :  { %1804 = dma.done.wait [#allocation6], 18432  }
  0x3a   :  { %1805 = vsyncadd [#allocation6], 4294948864  ;;  %v1492_v0 = vld [vmem:[#allocation5 + $0x4] ss:$8 sps:$4 sm:$0xff]   ;;  %v1496_v2 = vld [vmem:[#allocation5] ss:$8 sps:$4 sm:$0xff]   ;;  %v83_v40 = vlaneseq }
  0x3b   :  { %v1494_v1 = vld [vmem:[#allocation5 + $0x204] ss:$8 sps:$4 sm:$0xff]   ;;  %932 = vmatprep.subr.bf16.mxu1 %v1492_v0  ;;  %v1497_v3 = vld [vmem:[#allocation5 + $0x200] ss:$8 sps:$4 sm:$0xff]   ;;  %v1498_v4 = vld [vmem:[#allocation5 + $0x14] ss:$8 sps:$4 sm:$0xff]  }
  0x3c   :  { %1014 = vmatprep.subr.bf16.mxu0 %v1494_v1  ;;  %933 = vmatpush1.bf16.msra.mxu1 %v1496_v2  ;;  %v1500_v5 = vld [vmem:[#allocation5 + $0x214] ss:$8 sps:$4 sm:$0xff]   ;;  %v1502_v6 = vld [vmem:[#allocation5 + $0x10] ss:$8 sps:$4 sm:$0xff]   ;;  %v1504_v8 = vld [vmem:[#allocation5 + $0x24] ss:$8 sps:$4 sm:$0xff]  }
  0x3d   :  { %1015 = vmatpush1.bf16.msra.mxu0 %v1497_v3  ;;  %934 = vmatprep.subr.bf16.mxu1 %v1498_v4  ;;  %v1503_v7 = vld [vmem:[#allocation5 + $0x210] ss:$8 sps:$4 sm:$0xff]   ;;  %v1506_v9 = vld [vmem:[#allocation5 + $0x224] ss:$8 sps:$4 sm:$0xff]   ;;  %v1508_v10 = vld [vmem:[#allocation5 + $0x20] ss:$8 sps:$4 sm:$0xff]  }
  0x3e   :  { %1016 = vmatprep.subr.bf16.mxu0 %v1500_v5  ;;  %v1509_v11 = vld [vmem:[#allocation5 + $0x220] ss:$8 sps:$4 sm:$0xff]   ;;  %v1510_v12 = vld [vmem:[#allocation5 + $0x34] ss:$8 sps:$4 sm:$0xff]   ;;  %v1514_v14 = vld [vmem:[#allocation5 + $0x30] ss:$8 sps:$4 sm:$0xff]  }
  0x3f   :  { %v1512_v13 = vld [vmem:[#allocation5 + $0x234] ss:$8 sps:$4 sm:$0xff]   ;;  %v1515_v15 = vld [vmem:[#allocation5 + $0x230] ss:$8 sps:$4 sm:$0xff]   ;;  %v1516_v16 = vld [vmem:[#allocation5 + $0x44] ss:$8 sps:$4 sm:$0xff]  }
  0x40   :  { %935 = vmatpush1.bf16.msra.mxu1 %v1502_v6  ;;  %v1518_v17 = vld [vmem:[#allocation5 + $0x244] ss:$8 sps:$4 sm:$0xff]   ;;  %v1520_v18 = vld [vmem:[#allocation5 + $0x40] ss:$8 sps:$4 sm:$0xff]   ;;  %v1522_v20 = vld [vmem:[#allocation5 + $0x54] ss:$8 sps:$4 sm:$0xff]  }
  0x41   :  { %1017 = vmatpush1.bf16.msra.mxu0 %v1503_v7  ;;  %936 = vmatprep.subr.bf16.mxu1 %v1504_v8  ;;  %v1521_v19 = vld [vmem:[#allocation5 + $0x240] ss:$8 sps:$4 sm:$0xff]   ;;  %v1524_v21 = vld [vmem:[#allocation5 + $0x254] ss:$8 sps:$4 sm:$0xff]   ;;  %v1526_v22 = vld [vmem:[#allocation5 + $0x50] ss:$8 sps:$4 sm:$0xff]  }
  0x42   :  { %1018 = vmatprep.subr.bf16.mxu0 %v1506_v9  ;;  %v1527_v23 = vld [vmem:[#allocation5 + $0x250] ss:$8 sps:$4 sm:$0xff]   ;;  %v1528_v24 = vld [vmem:[#allocation5 + $0x64] ss:$8 sps:$4 sm:$0xff]   ;;  %v1532_v26 = vld [vmem:[#allocation5 + $0x60] ss:$8 sps:$4 sm:$0xff]  }
  0x43   :  { %v1530_v25 = vld [vmem:[#allocation5 + $0x264] ss:$8 sps:$4 sm:$0xff]   ;;  %v1533_v27 = vld [vmem:[#allocation5 + $0x260] ss:$8 sps:$4 sm:$0xff]   ;;  %v1534_v28 = vld [vmem:[#allocation5 + $0x74] ss:$8 sps:$4 sm:$0xff]  }
  0x44   :  { %937 = vmatpush1.bf16.msra.mxu1 %v1508_v10  ;;  %v1536_v29 = vld [vmem:[#allocation5 + $0x274] ss:$8 sps:$4 sm:$0xff]   ;;  %v1538_v30 = vld [vmem:[#allocation5 + $0x70] ss:$8 sps:$4 sm:$0xff]   ;;  %v1540_v32 = vld [vmem:[#allocation5 + $0x84] ss:$8 sps:$4 sm:$0xff]  }
  0x45   :  { %1019 = vmatpush1.bf16.msra.mxu0 %v1509_v11  ;;  %938 = vmatprep.subr.bf16.mxu1 %v1510_v12  ;;  %v1539_v31 = vld [vmem:[#allocation5 + $0x270] ss:$8 sps:$4 sm:$0xff]   ;;  %v1542_v33 = vld [vmem:[#allocation5 + $0x284] ss:$8 sps:$4 sm:$0xff]   ;;  %v1544_v34 = vld [vmem:[#allocation5 + $0x80] ss:$8 sps:$4 sm:$0xff]  }
  0x46   :  { %1020 = vmatprep.subr.bf16.mxu0 %v1512_v13  ;;  %v1545_v35 = vld [vmem:[#allocation5 + $0x280] ss:$8 sps:$4 sm:$0xff]   ;;  %v1546_v36 = vld [vmem:[#allocation5 + $0x94] ss:$8 sps:$4 sm:$0xff]   ;;  %v1817_v38 = vmov 1983009808  }
  0x47   :  { %v1548_v37 = vld [vmem:[#allocation5 + $0x294] ss:$8 sps:$4 sm:$0xff]   ;;  %v81_v39 = vunpack.c.l.s4 %v1817_v38  ;;  %v1550_v41 = vld [vmem:[#allocation5 + $0x90] ss:$8 sps:$4 sm:$0xff]   ;;  %v1552_v43 = vld [vmem:[#allocation5 + $0xa4] ss:$8 sps:$4 sm:$0xff]  }
  0x48   :  { %939 = vmatpush1.bf16.msra.mxu1 %v1514_v14  ;;  %v1551_v42 = vld [vmem:[#allocation5 + $0x290] ss:$8 sps:$4 sm:$0xff]   ;;  %v1554_v44 = vld [vmem:[#allocation5 + $0x2a4] ss:$8 sps:$4 sm:$0xff]   ;;  %v1882_v46 = vshrl.u32 %v83_v40, 7 }
  0x49   :  { %1021 = vmatpush1.bf16.msra.mxu0 %v1515_v15  ;;  %940 = vmatprep.subr.bf16.mxu1 %v1516_v16  ;;  %v82_v45 = vunpack.c.0.s8 %v81_v39  ;;  %v1556_v47 = vld [vmem:[#allocation5 + $0xa0] ss:$8 sps:$4 sm:$0xff]   ;;  %v1558_v49 = vld [vmem:[#allocation5 + $0xb4] ss:$8 sps:$4 sm:$0xff]   ;;  %v1562_v51 = vld [vmem:[#allocation5 + $0xb0] ss:$8 sps:$4 sm:$0xff]  }
  0x4a   :  { %1022 = vmatprep.subr.bf16.mxu0 %v1518_v17  ;;  %v1557_v48 = vld [vmem:[#allocation5 + $0x2a0] ss:$8 sps:$4 sm:$0xff]   ;;  %v1560_v50 = vld [vmem:[#allocation5 + $0x2b4] ss:$8 sps:$4 sm:$0xff]   ;;  %v1563_v52 = vld [vmem:[#allocation5 + $0x2b0] ss:$8 sps:$4 sm:$0xff]  }
  0x4b   :  { %v85_v53 = vsub.s32 %v82_v45, %v1882_v46  ;;  %v1564_v54 = vld [vmem:[#allocation5 + $0xc4] ss:$8 sps:$4 sm:$0xff]   ;;  %v1588_v55 = vld [vmem:[#allocation2] ss:$16 sps:$4 sm:$0xff]   ;;  %v1570_v62 = vld [vmem:[#allocation5 + $0xd4] ss:$8 sps:$4 sm:$0xff]  }
  0x4c   :  { %941 = vmatpush1.bf16.msra.mxu1 %v1520_v18  ;;  %v1591_v56 = vld [vmem:[#allocation2 + $0x20] ss:$16 sps:$4 sm:$0xff]   ;;  %v1566_v57 = vld [vmem:[#allocation5 + $0x2c4] ss:$8 sps:$4 sm:$0xff]   ;;  %v1597_v0 = vld [vmem:[#allocation2 + $0x8] ss:$16 sps:$4 sm:$0xff]  }
  0x4d   :  { %1023 = vmatpush1.bf16.msra.mxu0 %v1521_v19  ;;  %942 = vmatprep.subr.bf16.mxu1 %v1522_v20  ;;  %v1568_v58 = vld [vmem:[#allocation5 + $0xc0] ss:$8 sps:$4 sm:$0xff]   ;;  %v86_v60 = vrot.slane %v1588_v55, %v85_v53  ;;  %v100_v61 = vrot.slane %v1591_v56, %v85_v53  ;;  %v1572_v2 = vld [vmem:[#allocation5 + $0x2d4] ss:$8 sps:$4 sm:$0xff]   ;;  %v1574_v3 = vld [vmem:[#allocation5 + $0xd0] ss:$8 sps:$4 sm:$0xff]   ;;  %v122_v6 = vrot.slane %v1597_v0, %v85_v53 }
  0x4e   :  { %1024 = vmatprep.subr.bf16.mxu0 %v1524_v21  ;;  %v1569_v59 = vld [vmem:[#allocation5 + $0x2c0] ss:$8 sps:$4 sm:$0xff]   ;;  %v1575_v4 = vld [vmem:[#allocation5 + $0x2d0] ss:$8 sps:$4 sm:$0xff]   ;;  %v1576_v8 = vld [vmem:[#allocation5 + $0xe4] ss:$8 sps:$4 sm:$0xff]  }
  0x4f   :  { %v109_v63 = vcombine.high %v86_v60, %v100_v61  ;;  %v1600_v1 = vld [vmem:[#allocation2 + $0x28] ss:$16 sps:$4 sm:$0xff]   ;;  %v1578_v9 = vld [vmem:[#allocation5 + $0x2e4] ss:$8 sps:$4 sm:$0xff]   ;;  %v1582_v18 = vld [vmem:[#allocation5 + $0xf4] ss:$8 sps:$4 sm:$0xff]  }
  0x50   :  { %943 = vmatpush1.bf16.msra.mxu1 %v1526_v22  ;;  %v136_v7 = vrot.slane %v1600_v1, %v85_v53  ;;  %v1590_v10 = vld [vmem:[#allocation2 + $0x4] ss:$16 sps:$4 sm:$0xff]   ;;  %v1599_v13 = vld [vmem:[#allocation2 + $0xc] ss:$16 sps:$4 sm:$0xff]   ;;  %v1580_v16 = vld [vmem:[#allocation5 + $0xe0] ss:$8 sps:$4 sm:$0xff]  }
  0x51   :  { %1025 = vmatpush1.bf16.msra.mxu0 %v1527_v23  ;;  %944 = vmatprep.subr.bf16.mxu1 %v1528_v24  ;;  %v157_v5 = vpack.c.bf16 %v109_v63, %v109_v63  ;;  %v1593_v12 = vld [vmem:[#allocation2 + $0x24] ss:$16 sps:$4 sm:$0xff]   ;;  %v1602_v14 = vld [vmem:[#allocation2 + $0x2c] ss:$16 sps:$4 sm:$0xff]   ;;  %v1581_v17 = vld [vmem:[#allocation5 + $0x2e0] ss:$8 sps:$4 sm:$0xff]   ;;  %v1885_v20 = vrot.slane %v1590_v10, %v85_v53  ;;  %v1889_v22 = vrot.slane %v1599_v13, %v85_v53 }
  0x52   :  { %1026 = vmatprep.subr.bf16.mxu0 %v1530_v25  ;;  %v145_v11 = vcombine.high %v122_v6, %v136_v7  ;;  %v1584_v19 = vld [vmem:[#allocation5 + $0x2f4] ss:$8 sps:$4 sm:$0xff]   ;;  %v1887_v21 = vrot.slane %v1593_v12, %v85_v53  ;;  %v1891_v23 = vrot.slane %v1602_v14, %v85_v53  ;;  %v1586_v24 = vld [vmem:[#allocation5 + $0xf0] ss:$8 sps:$4 sm:$0xff]   ;;  %v1615_v45 = vld [vmem:[#allocation5 + $0x320] ss:$8 sps:$4 sm:$0xff]  }
  0x53   :  { %964 = vmatprep.mubr.bf16.mxu1 %v157_v5  ;;  %v1587_v25 = vld [vmem:[#allocation5 + $0x2f0] ss:$8 sps:$4 sm:$0xff]   ;;  %v1624_v53 = vld [vmem:[#allocation5 + $0x140] ss:$8 sps:$4 sm:$0xff]   ;;  %v1632_v55 = vld [vmem:[#allocation5 + $0x154] ss:$8 sps:$4 sm:$0xff]  }
  0x54   :  { %945 = vmatpush1.bf16.msra.mxu1 %v1532_v26  ;;  %v161_v15 = vpack.c.bf16 %v145_v11, %v145_v11  ;;  %v108_v26 = vcombine.low %v86_v60, %v100_v61  ;;  %v1606_v40 = vld [vmem:[#allocation5 + $0x110] ss:$8 sps:$4 sm:$0xff]   ;;  %v1635_v56 = vld [vmem:[#allocation5 + $0x354] ss:$8 sps:$4 sm:$0xff]   ;;  %v1641_v60 = vld [vmem:[#allocation5 + $0x364] ss:$8 sps:$4 sm:$0xff]  }
  0x55   :  { %1027 = vmatpush1.bf16.msra.mxu0 %v1533_v27  ;;  %946 = vmatprep.subr.bf16.mxu1 %v1534_v28  ;;  %v144_v27 = vcombine.low %v122_v6, %v136_v7  ;;  %v1596_v28 = vld [vmem:[#allocation5 + $0x104] ss:$8 sps:$4 sm:$0xff]   ;;  %v1636_v61 = vld [vmem:[#allocation5 + $0x160] ss:$8 sps:$4 sm:$0xff]   ;;  %v1644_v63 = vld [vmem:[#allocation5 + $0x174] ss:$8 sps:$4 sm:$0xff]  }
  0x56   :  { %1028 = vmatprep.subr.bf16.mxu0 %v1536_v29  ;;  %1046 = vmatprep.mubr.bf16.mxu0 %v161_v15  ;;  %v1605_v29 = vld [vmem:[#allocation5 + $0x304] ss:$8 sps:$4 sm:$0xff]   ;;  %v1647_v0 = vld [vmem:[#allocation5 + $0x374] ss:$8 sps:$4 sm:$0xff]   ;;  %v1642_v1 = vld [vmem:[#allocation5 + $0x170] ss:$8 sps:$4 sm:$0xff]  }
  0x57   :  { %v1648_v5 = vld [vmem:[#allocation5 + $0x180] ss:$8 sps:$4 sm:$0xff]   ;;  %v1656_v7 = vld [vmem:[#allocation5 + $0x194] ss:$8 sps:$4 sm:$0xff]   ;;  %v1657_v10 = vld [vmem:[#allocation5 + $0x390] ss:$8 sps:$4 sm:$0xff]  }
  0x58   :  { %947 = vmatpush1.bf16.msra.mxu1 %v1538_v30  ;;  %v111_v30 = vcombine.high %v1885_v20, %v1887_v21  ;;  %v1651_v6 = vld [vmem:[#allocation5 + $0x380] ss:$8 sps:$4 sm:$0xff]   ;;  %v1662_v11 = vld [vmem:[#allocation5 + $0x1a4] ss:$8 sps:$4 sm:$0xff]   ;;  %v1668_v15 = vld [vmem:[#allocation5 + $0x1b4] ss:$8 sps:$4 sm:$0xff]  }
  0x59   :  { %1029 = vmatpush1.bf16.msra.mxu0 %v1539_v31  ;;  %948 = vmatprep.subr.bf16.mxu1 %v1540_v32  ;;  %v147_v31 = vcombine.high %v1889_v22, %v1891_v23  ;;  %v1594_v32 = vld [vmem:[#allocation5 + $0x100] ss:$8 sps:$4 sm:$0xff]   ;;  %v1665_v12 = vld [vmem:[#allocation5 + $0x3a4] ss:$8 sps:$4 sm:$0xff]  }
  0x5a   :  { %1030 = vmatprep.subr.bf16.mxu0 %v1542_v33  ;;  %v1603_v33 = vld [vmem:[#allocation5 + $0x300] ss:$8 sps:$4 sm:$0xff]   ;;  %v159_v38 = vpack.c.bf16 %v111_v30, %v111_v30  ;;  %v1681_v30 = vld [vmem:[#allocation5 + $0x3d0] ss:$8 sps:$4 sm:$0xff]  }
  0x5b   :  { %v163_v39 = vpack.c.bf16 %v147_v31, %v147_v31  ;;  %v1660_v13 = vld [vmem:[#allocation5 + $0x1a0] ss:$8 sps:$4 sm:$0xff]   ;;  %v1686_v31 = vld [vmem:[#allocation5 + $0x1e4] ss:$8 sps:$4 sm:$0xff]  }
  0x5c   :  { %949 = vmatpush1.bf16.msra.mxu1 %v1544_v34  ;;  %v156_v34 = vpack.c.bf16 %v108_v26, %v108_v26  ;;  %v1663_v14 = vld [vmem:[#allocation5 + $0x3a0] ss:$8 sps:$4 sm:$0xff]  }
  0x5d   :  { %1031 = vmatpush1.bf16.msra.mxu0 %v1545_v35  ;;  %950 = vmatprep.subr.bf16.mxu1 %v1546_v36  ;;  %v160_v35 = vpack.c.bf16 %v144_v27, %v144_v27  ;;  %v1608_v36 = vld [vmem:[#allocation5 + $0x114] ss:$8 sps:$4 sm:$0xff]   ;;  %v1675_v26 = vld [vmem:[#allocation5 + $0x3c0] ss:$8 sps:$4 sm:$0xff]  }
  0x5e   :  { %1032 = vmatprep.subr.bf16.mxu0 %v1548_v37  ;;  %v1611_v37 = vld [vmem:[#allocation5 + $0x314] ss:$8 sps:$4 sm:$0xff]  }
  0x5f   :  { %v1680_v27 = vld [vmem:[#allocation5 + $0x1d4] ss:$8 sps:$4 sm:$0xff]  }
  0x60   :  { %951 = vmatpush1.bf16.msra.mxu1 %v1550_v41  ;;  %v1609_v41 = vld [vmem:[#allocation5 + $0x310] ss:$8 sps:$4 sm:$0xff]  }
  0x61   :  { %1033 = vmatpush1.bf16.msra.mxu0 %v1551_v42  ;;  %952 = vmatprep.subr.bf16.mxu1 %v1552_v43  ;;  %v1614_v42 = vld [vmem:[#allocation5 + $0x124] ss:$8 sps:$4 sm:$0xff]  }
  0x62   :  { %1034 = vmatprep.subr.bf16.mxu0 %v1554_v44  ;;  %v1617_v43 = vld [vmem:[#allocation5 + $0x324] ss:$8 sps:$4 sm:$0xff]   ;;  %v1612_v44 = vld [vmem:[#allocation5 + $0x120] ss:$8 sps:$4 sm:$0xff]  }
  0x64   :  { %953 = vmatpush1.bf16.msra.mxu1 %v1556_v47  ;;  %v1620_v47 = vld [vmem:[#allocation5 + $0x134] ss:$8 sps:$4 sm:$0xff]  }
  0x65   :  { %1035 = vmatpush1.bf16.msra.mxu0 %v1557_v48  ;;  %954 = vmatprep.subr.bf16.mxu1 %v1558_v49  ;;  %v1623_v48 = vld [vmem:[#allocation5 + $0x334] ss:$8 sps:$4 sm:$0xff]   ;;  %v1618_v49 = vld [vmem:[#allocation5 + $0x130] ss:$8 sps:$4 sm:$0xff]  }
  0x66   :  { %1036 = vmatprep.subr.bf16.mxu0 %v1560_v50  ;;  %v1621_v50 = vld [vmem:[#allocation5 + $0x330] ss:$8 sps:$4 sm:$0xff]  }
  0x68   :  { %955 = vmatpush1.bf16.msra.mxu1 %v1562_v51  ;;  %v1626_v51 = vld [vmem:[#allocation5 + $0x144] ss:$8 sps:$4 sm:$0xff]  }
  0x69   :  { %1037 = vmatpush1.bf16.msra.mxu0 %v1563_v52  ;;  %956 = vmatprep.subr.bf16.mxu1 %v1564_v54  ;;  %v1629_v52 = vld [vmem:[#allocation5 + $0x344] ss:$8 sps:$4 sm:$0xff]   ;;  %v1627_v54 = vld [vmem:[#allocation5 + $0x340] ss:$8 sps:$4 sm:$0xff]  }
  0x6a   :  { %1038 = vmatprep.subr.bf16.mxu0 %v1566_v57  ;;  %v1630_v57 = vld [vmem:[#allocation5 + $0x150] ss:$8 sps:$4 sm:$0xff]  }
  0x6c   :  { %957 = vmatpush1.bf16.msra.mxu1 %v1568_v58  ;;  %v1633_v58 = vld [vmem:[#allocation5 + $0x350] ss:$8 sps:$4 sm:$0xff]  }
  0x6d   :  { %1039 = vmatpush1.bf16.msra.mxu0 %v1569_v59  ;;  %958 = vmatprep.subr.bf16.mxu1 %v1570_v62  ;;  %v1638_v59 = vld [vmem:[#allocation5 + $0x164] ss:$8 sps:$4 sm:$0xff]   ;;  %v1639_v62 = vld [vmem:[#allocation5 + $0x360] ss:$8 sps:$4 sm:$0xff]  }
  0x6e   :  { %1040 = vmatprep.subr.bf16.mxu0 %v1572_v2  ;;  %v1645_v2 = vld [vmem:[#allocation5 + $0x370] ss:$8 sps:$4 sm:$0xff]  }
  0x70   :  { %959 = vmatpush1.bf16.msra.mxu1 %v1574_v3  ;;  %v1650_v3 = vld [vmem:[#allocation5 + $0x184] ss:$8 sps:$4 sm:$0xff]  }
  0x71   :  { %1041 = vmatpush1.bf16.msra.mxu0 %v1575_v4  ;;  %960 = vmatprep.subr.bf16.mxu1 %v1576_v8  ;;  %v1653_v4 = vld [vmem:[#allocation5 + $0x384] ss:$8 sps:$4 sm:$0xff]   ;;  %v1659_v8 = vld [vmem:[#allocation5 + $0x394] ss:$8 sps:$4 sm:$0xff]  }
  0x72   :  { %1042 = vmatprep.subr.bf16.mxu0 %v1578_v9  ;;  %v1654_v9 = vld [vmem:[#allocation5 + $0x190] ss:$8 sps:$4 sm:$0xff]  }
  0x74   :  { %961 = vmatpush1.bf16.msra.mxu1 %v1580_v16  ;;  %v1671_v16 = vld [vmem:[#allocation5 + $0x3b4] ss:$8 sps:$4 sm:$0xff]  }
  0x75   :  { %1043 = vmatpush1.bf16.msra.mxu0 %v1581_v17  ;;  %962 = vmatprep.subr.bf16.mxu1 %v1582_v18  ;;  %v1666_v17 = vld [vmem:[#allocation5 + $0x1b0] ss:$8 sps:$4 sm:$0xff]  }
  0x76   :  { %1044 = vmatprep.subr.bf16.mxu0 %v1584_v19  ;;  %v1669_v18 = vld [vmem:[#allocation5 + $0x3b0] ss:$8 sps:$4 sm:$0xff]   ;;  %v1674_v19 = vld [vmem:[#allocation5 + $0x1c4] ss:$8 sps:$4 sm:$0xff]  }
  0x78   :  { %963 = vmatpush1.bf16.msra.mxu1 %v1586_v24  ;;  %v1677_v24 = vld [vmem:[#allocation5 + $0x3c4] ss:$8 sps:$4 sm:$0xff]  }
  0x79   :  { %1045 = vmatpush1.bf16.msra.mxu0 %v1587_v25  ;;  %973 = vmatprep.subr.bf16.mxu1 %v1596_v28  ;;  %v1672_v25 = vld [vmem:[#allocation5 + $0x1c0] ss:$8 sps:$4 sm:$0xff]   ;;  %v1683_v28 = vld [vmem:[#allocation5 + $0x3d4] ss:$8 sps:$4 sm:$0xff]  }
  0x7a   :  { %1055 = vmatprep.subr.bf16.mxu0 %v1605_v29  ;;  %v1678_v29 = vld [vmem:[#allocation5 + $0x1d0] ss:$8 sps:$4 sm:$0xff]  }
  0x7b   :  { %965 = vmatmul.mubr.bf16.vlgmr.msra.gmra.mrb[0].mxu1 %v156_v34  ;;  %v1687_v34 = vld [vmem:[#allocation5 + $0x3e0] ss:$8 sps:$4 sm:$0xff]  }
  0x7c   :  { %1047 = vmatmul.mubr.bf16.vlgmr.msra.gmra.mrb[0].mxu0 %v160_v35  ;;  %974 = vmatpush1.bf16.msra.mxu1 %v1594_v32  ;;  %v1689_v32 = vld [vmem:[#allocation5 + $0x3e4] ss:$8 sps:$4 sm:$0xff]   ;;  %v1692_v35 = vld [vmem:[#allocation5 + $0x1f4] ss:$8 sps:$4 sm:$0xff]  }
  0x7d   :  { %1056 = vmatpush1.bf16.msra.mxu0 %v1603_v33  ;;  %975 = vmatprep.subr.bf16.mxu1 %v1608_v36  ;;  %v1684_v33 = vld [vmem:[#allocation5 + $0x1e0] ss:$8 sps:$4 sm:$0xff]   ;;  %v1695_v36 = vld [vmem:[#allocation5 + $0x3f4] ss:$8 sps:$4 sm:$0xff]  }
  0x7e   :  { %1057 = vmatprep.subr.bf16.mxu0 %v1611_v37  ;;  %1005 = vmatprep.mubr.bf16.mxu1 %v159_v38  ;;  %v110_v37 = vcombine.low %v1885_v20, %v1887_v21  ;;  %v146_v38 = vcombine.low %v1889_v22, %v1891_v23  ;;  %v1699_v20 = vld [vmem:[#allocation7 + $0x8] sm:$0xff]   ;;  %v1700_v21 = vld [vmem:[#allocation7 + $0x50] sm:$0xff]   ;;  %v1702_v23 = vld [vmem:[#allocation7 + $0x58] sm:$0xff]  }
  0x7f   :  { %1087 = vmatprep.mubr.bf16.mxu0 %v163_v39  ;;  %v1690_v39 = vld [vmem:[#allocation5 + $0x1f0] ss:$8 sps:$4 sm:$0xff]  }
  0x80   :  { %976 = vmatpush1.bf16.msra.mxu1 %v1606_v40  ;;  %v1693_v40 = vld [vmem:[#allocation5 + $0x3f0] ss:$8 sps:$4 sm:$0xff]  }
  0x81   :  { %1058 = vmatpush1.bf16.msra.mxu0 %v1609_v41  ;;  %977 = vmatprep.subr.bf16.mxu1 %v1614_v42  ;;  %v1696_v41 = vld [vmem:[#allocation7 + $0x40] sm:$0xff]   ;;  %v158_v42 = vpack.c.bf16 %v110_v37, %v110_v37  ;;  %v1701_v22 = vld [vmem:[#allocation7 + $0x10] sm:$0xff]  }
  0x82   :  { %1059 = vmatprep.subr.bf16.mxu0 %v1617_v43  ;;  %v162_v43 = vpack.c.bf16 %v146_v38, %v146_v38 }
  0x84   :  { %978 = vmatpush1.bf16.msra.mxu1 %v1612_v44  ;;  %v1697_v44 = vld [vmem:[#allocation7] sm:$0xff]  }
  0x85   :  { %1060 = vmatpush1.bf16.msra.mxu0 %v1615_v45  ;;  %979 = vmatprep.subr.bf16.mxu1 %v1620_v47  ;;  %v1698_v45 = vld [vmem:[#allocation7 + $0x48] sm:$0xff]   ;;  %v1703_v47 = vld [vmem:[#allocation7 + $0x18] sm:$0xff]  }
  0x86   :  { %1061 = vmatprep.subr.bf16.mxu0 %v1623_v48  ;;  %v1704_v48 = vld [vmem:[#allocation7 + $0x60] sm:$0xff]  }
  0x88   :  { %980 = vmatpush1.bf16.msra.mxu1 %v1618_v49  ;;  %v1705_v49 = vld [vmem:[#allocation7 + $0x20] sm:$0xff]  }
  0x89   :  { %1062 = vmatpush1.bf16.msra.mxu0 %v1621_v50  ;;  %981 = vmatprep.subr.bf16.mxu1 %v1626_v51  ;;  %v1706_v50 = vld [vmem:[#allocation7 + $0x68] sm:$0xff]  }
  0x8a   :  { %1063 = vmatprep.subr.bf16.mxu0 %v1629_v52  ;;  %v1707_v51 = vld [vmem:[#allocation7 + $0x28] sm:$0xff]   ;;  %v1708_v52 = vld [vmem:[#allocation7 + $0x70] sm:$0xff]  }
  0x8c   :  { %982 = vmatpush1.bf16.msra.mxu1 %v1624_v53  ;;  %v1709_v53 = vld [vmem:[#allocation7 + $0x30] sm:$0xff]  }
  0x8d   :  { %1064 = vmatpush1.bf16.msra.mxu0 %v1627_v54  ;;  %983 = vmatprep.subr.bf16.mxu1 %v1632_v55  ;;  %v1710_v54 = vld [vmem:[#allocation7 + $0x78] sm:$0xff]  }
  0x8e   :  { %1065 = vmatprep.subr.bf16.mxu0 %v1635_v56  ;;  %v1711_v55 = vld [vmem:[#allocation7 + $0x38] sm:$0xff]   ;;  %v1100_v56 = vsub.s32 0, %v1882_v46 }
  0x90   :  { %984 = vmatpush1.bf16.msra.mxu1 %v1630_v57  ;;  %v1096_v57 = vld [vmem:[%s1920_s2] sm:$0x3] }
  0x91   :  { %1066 = vmatpush1.bf16.msra.mxu0 %v1633_v58  ;;  %985 = vmatprep.subr.bf16.mxu1 %v1638_v59  ;;  %v1104_v58 = vsub.s32 1, %v1882_v46  ;;  %v1101_v59 = vrot.slane %v1096_v57, %v1100_v56 }
  0x92   :  { %1067 = vmatprep.subr.bf16.mxu0 %v1641_v60 }
  0x94   :  { %986 = vmatpush1.bf16.msra.mxu1 %v1636_v61 }
  0x95   :  { %1068 = vmatpush1.bf16.msra.mxu0 %v1639_v62  ;;  %987 = vmatprep.subr.bf16.mxu1 %v1644_v63  ;;  %v1105_v62 = vrot.slane %v1096_v57, %v1104_v58 }
  0x96   :  { %1069 = vmatprep.subr.bf16.mxu0 %v1647_v0 }
  0x98   :  { %988 = vmatpush1.bf16.msra.mxu1 %v1642_v1 }
  0x99   :  { %1070 = vmatpush1.bf16.msra.mxu0 %v1645_v2  ;;  %989 = vmatprep.subr.bf16.mxu1 %v1650_v3 }
  0x9a   :  { %1071 = vmatprep.subr.bf16.mxu0 %v1653_v4 }
  0x9c   :  { %990 = vmatpush1.bf16.msra.mxu1 %v1648_v5 }
  0x9d   :  { %1072 = vmatpush1.bf16.msra.mxu0 %v1651_v6  ;;  %991 = vmatprep.subr.bf16.mxu1 %v1656_v7 }
  0x9e   :  { %1073 = vmatprep.subr.bf16.mxu0 %v1659_v8 }
  0xa0   :  { %992 = vmatpush1.bf16.msra.mxu1 %v1654_v9 }
  0xa1   :  { %1074 = vmatpush1.bf16.msra.mxu0 %v1657_v10  ;;  %993 = vmatprep.subr.bf16.mxu1 %v1662_v11 }
  0xa2   :  { %1075 = vmatprep.subr.bf16.mxu0 %v1665_v12 }
  0xa4   :  { %994 = vmatpush1.bf16.msra.mxu1 %v1660_v13 }
  0xa5   :  { %1076 = vmatpush1.bf16.msra.mxu0 %v1663_v14  ;;  %995 = vmatprep.subr.bf16.mxu1 %v1668_v15 }
  0xa6   :  { %1077 = vmatprep.subr.bf16.mxu0 %v1671_v16 }
  0xa8   :  { %996 = vmatpush1.bf16.msra.mxu1 %v1666_v17 }
  0xa9   :  { %1078 = vmatpush1.bf16.msra.mxu0 %v1669_v18  ;;  %997 = vmatprep.subr.bf16.mxu1 %v1674_v19 }
  0xaa   :  { %1079 = vmatprep.subr.bf16.mxu0 %v1677_v24 }
  0xac   :  { %998 = vmatpush1.bf16.msra.mxu1 %v1672_v25 }
  0xad   :  { %1080 = vmatpush1.bf16.msra.mxu0 %v1675_v26  ;;  %999 = vmatprep.subr.bf16.mxu1 %v1680_v27 }
  0xae   :  { %1081 = vmatprep.subr.bf16.mxu0 %v1683_v28 }
  0xb0   :  { %1000 = vmatpush1.bf16.msra.mxu1 %v1678_v29 }
  0xb1   :  { %1082 = vmatpush1.bf16.msra.mxu0 %v1681_v30  ;;  %1001 = vmatprep.subr.bf16.mxu1 %v1686_v31 }
  0xb2   :  { %1083 = vmatprep.subr.bf16.mxu0 %v1689_v32 }
  0xb4   :  { %1002 = vmatpush1.bf16.msra.mxu1 %v1684_v33 }
  0xb5   :  { %1084 = vmatpush1.bf16.msra.mxu0 %v1687_v34  ;;  %1003 = vmatprep.subr.bf16.mxu1 %v1692_v35 }
  0xb6   :  { %1085 = vmatprep.subr.bf16.mxu0 %v1695_v36 }
  0xb8   :  { %1004 = vmatpush1.bf16.msra.mxu1 %v1690_v39 }
  0xb9   :  { %1086 = vmatpush1.bf16.msra.mxu0 %v1693_v40  ;;  %1447 = vmatprep.subr.bf16.mxu1 %v1696_v41 }
  0xbb   :  { %1006 = vmatmul.mubr.bf16.vlgmr.msra.gmra.mrb[0].mxu1 %v158_v42 }
  0xbc   :  { %1088 = vmatmul.mubr.bf16.vlgmr.msra.gmra.mrb[0].mxu0 %v162_v43  ;;  %1448 = vmatpush3.bf16.msra.mxu1 %v1697_v44 }
  0xbd   :  { %1449 = vmatprep.subr.bf16.mxu1 %v1698_v45 }
  0xc0   :  { %1450 = vmatpush3.bf16.msra.mxu1 %v1699_v20 }
  0xc1   :  { %1451 = vmatprep.subr.bf16.mxu1 %v1700_v21 }
  0xc4   :  { %1452 = vmatpush3.bf16.msra.mxu1 %v1701_v22 }
  0xc5   :  { %1453 = vmatprep.subr.bf16.mxu1 %v1702_v23 }
  0xc8   :  { %1454 = vmatpush3.bf16.msra.mxu1 %v1703_v47 }
  0xc9   :  { %1455 = vmatprep.subr.bf16.mxu1 %v1704_v48 }
  0xcc   :  { %1456 = vmatpush3.bf16.msra.mxu1 %v1705_v49 }
  0xcd   :  { %1457 = vmatprep.subr.bf16.mxu1 %v1706_v50 }
  0xd0   :  { %1458 = vmatpush3.bf16.msra.mxu1 %v1707_v51 }
  0xd1   :  { %1459 = vmatprep.subr.bf16.mxu1 %v1708_v52 }
  0xd4   :  { %1460 = vmatpush3.bf16.msra.mxu1 %v1709_v53 }
  0xd5   :  { %1461 = vmatprep.subr.bf16.mxu1 %v1710_v54 }
  0xd8   :  { %1462 = vmatpush3.bf16.msra.mxu1 %v1711_v55 }
 0x18e   :  { %v1007_v60 = vpop.f32.mrb[0].mxu1 }
 0x18f   :  { %v1089_v61 = vpop.f32.mrb[0].mxu0  ;;  %v1009_v0 = vpop.f32.mrb[1].mxu1 }
 0x190   :  { %v1469_v63 = vadd.f32 %v1089_v61, %v1007_v60  ;;  %v1091_v1 = vpop.f32.mrb[1].mxu0  ;;  %v1011_v3 = vpop.f32.mrb[2].mxu1 }
 0x191   :  { %v1470_v2 = vadd.f32 %v1091_v1, %v1009_v0  ;;  %v1093_v4 = vpop.f32.mrb[2].mxu0  ;;  %v1012_v6 = vpop.f32.mrb[3].mxu1 }
 0x192   :  { %v1108_v5 = vsub.f32 %v1469_v63, %v1101_v59  ;;  %v1094_v7 = vpop.f32.mrb[3].mxu0 }
 0x193   :  { %v1109_v8 = vsub.f32 %v1470_v2, %v1105_v62 }
 0x194   :  { %v1110_v9 = vmul.f32 %v1108_v5, %v1108_v5 }
 0x195   :  { %v1111_v10 = vmul.f32 %v1109_v8, %v1109_v8 }
 0x196   :  { %v1112_v12 = vpack.c.bf16 %v1110_v9, %v1110_v9 }
 0x197   :  { %v1113_v11 = vpack.c.bf16 %v1111_v10, %v1111_v10 }
 0x199   :  { %1274 = vmatprep.mubr.bf16.mxu1 %v1113_v11 }
 0x19a   :  { %1275 = vmatmul.mubr.bf16.vlgmr.msra.gmra.mrb[4].mxu1 %v1112_v12 }
 0x26d   :  { %v1463_v46 = vpop.f32.mrb[4].mxu1 }
 0x26e   :  { %v1464_v13 = vpop.f32.mrb[5].mxu1 }
 0x26f   :  { %v1465_v14 = vadd.f32 %v1464_v13, %v1463_v46  ;;  %v1466_v15 = vpop.f32.mrb[6].mxu1 }
 0x270   :  { %v1467_v16 = vpop.f32.mrb[7].mxu1 }
 0x271   :  { %v1282_v17 = vmul.f32 1.442695, %v1465_v14 }
 0x273   :  { %1712 = vpow2.f32 %v1282_v17 }
 0x27d   :  { %v1713_v18 = vpop.eup %1712 }
 0x27e   :  { %1284 = vst [vmem:[#allocation8] sm:$0xff] %v1713_v18 }
 0x27f   :  { %1289 = vsyncadd [#allocation4], 96  ;;  %s1818_s2 = smov [#allocation8]  }
 0x280   :  { %s1290_s5 = sshll.u32 %s1818_s2, 4  ;;  %s1291_s5 = int_to_ptr.vmem [resolvable:$true] %s1290_s5 }
 0x281   :  { %s1780_s6 = scalar_lea.vmem %s1291_s5, 32  ;;  %s1784_s7 = scalar_lea.vmem %s1291_s5, 128 }
 0x282   :  { %p1781_p10 = scmp.ne.s32.totalorder %s1291_s5, %s1780_s6  ;;  %p1785_p11 = scmp.lt.s32.totalorder %s1291_s5, %s1291_s5 }
 0x283   :  { %p1786_p12 = scmp.lt.s32.totalorder %s1784_s7, %s1780_s6 }
 0x285   :  { %p1787_p13 = por %p1786_p12, %p1785_p11 }
 0x287   :  { %p1788_p0 = pnand %p1787_p13, %p1781_p10 }
 0x289   :  { %1791 = shalt.err (!%p1788_p0)
}
 0x28a   :  { %s1792_s10 = scalar_lea.hbm %s1922_s4, 32 }
 0x28b   :  { %p1793_p1 = scmp.ne.s32.totalorder %s1922_s4, %s1792_s10  ;;  %p1796_p2 = scmp.lt.u32.totalorder %s1792_s10, %s1922_s4 }
 0x28d   :  { %p1798_p3 = pnand %p1796_p2, %p1793_p1 }
 0x28f   :  { %1801 = shalt.err (!%p1798_p3)
}
 0x290   :  { %s1819_s14 = smov 32   ;;  %s1820_s15 = smov 2  }
 0x291   :  { %1296 = dma.vmem_to_hbm [thread:$0]  %s1291_s5, 32, %s1922_s4, [#allocation4], %s1819_s14, %s1819_s14, %s1820_s15  }
 0x292   :  { %1806 = dma.done.wait [#allocation4], 128  }
 0x293   :  { %1807 = vsyncadd [#allocation4], 4294967168 }
 0x294   :  { %1300 = vsyncpa [#allocation3], 1 }
 0x295   :  { %1301 = vsyncpa [#allocation6], 1 }
 0x296   :  { %1302 = vsyncpa [#allocation4], 1 }

</bundles_post_ra>
